<compile_context>
chip_gen: v7x
topology: tpu7x:2x2x1
jax: 0.10.0
libtpu: 0.0.40
codegen_flags: <defaults>
</compile_context>

<pallas_src>
import math
import jax
import jax.numpy as jnp
from jax import lax
from jax.experimental import pallas as pl
from jax.experimental.pallas import tpu as pltpu


# ---------------------------------------------------------------------------
# helpers
# ---------------------------------------------------------------------------

def _pick_tile(n, candidates=(512, 256, 128, 64, 32, 16, 8)):
    """Largest candidate tile that evenly divides n, else the full extent."""
    for t in candidates:
        if n % t == 0:
            return t
    return n


def _layernorm(x, gamma, beta, eps=1e-5):
    mu = jnp.mean(x, axis=-1, keepdims=True)
    var = jnp.mean((x - mu) ** 2, axis=-1, keepdims=True)
    return (x - mu) * lax.rsqrt(var + eps) * gamma + beta


def _const_index_map(ndim):
    """Constant (resident) block index map with ndim bound at construction time."""
    return lambda b, qi: (0,) * ndim


def _default_vmem_limit_bytes():
    """Explicit scoped-VMEM budget: ~3/4 of physical, capped at 112 MiB.
    v5e/v6e (128 MiB physical) -> ~96-112 MiB; v7x (64 MiB) -> ~48 MiB."""
    try:
        cap = int(pltpu.get_tpu_info().vmem_capacity_bytes)
    except Exception:
        cap = 64 * 1024 * 1024
    return int(max(min(cap * 3 // 4, 112 * 1024 * 1024), 32 * 1024 * 1024))


# ---------------------------------------------------------------------------
# Pallas kernels
# ---------------------------------------------------------------------------

def _linear_kernel(x_ref, wt_ref, b_ref, o_ref):
    # x: (TM, K) f32/bf16, wt: (K, N) bf16 pre-transposed, b: (1, N) f32
    o_ref[...] = (
        jnp.dot(x_ref[...].astype(jnp.bfloat16), wt_ref[...],
                preferred_element_type=jnp.float32)
        + b_ref[...]
    ).astype(o_ref.dtype)


def pallas_linear(x2d, wt, b2, out_dtype=jnp.float32, vmem_limit=None):
    """x2d: (M, K), wt: (K, N) bf16 pre-transposed, b2: (1, N) f32 -> (M, N) out_dtype."""
    M, K = x2d.shape
    N = wt.shape[1]
    TM = _pick_tile(M)
    return pl.pallas_call(
        _linear_kernel,
        grid=(M // TM,),
        out_shape=jax.ShapeDtypeStruct((M, N), out_dtype),
        in_specs=[
            pl.BlockSpec((TM, K), lambda i: (i, 0)),
            pl.BlockSpec((K, N), lambda i: (0, 0)),
            pl.BlockSpec((1, N), lambda i: (0, 0)),
        ],
        out_specs=pl.BlockSpec((TM, N), lambda i: (i, 0)),
        compiler_params=pltpu.CompilerParams(
            dimension_semantics=("parallel",),
            vmem_limit_bytes=vmem_limit),
    )(x2d, wt, b2)


def make_encoder_layer_kernel(S, TQ, D, H):
    DH = D // H

    def kernel(x_ref, wq_ref, bq_ref, wkv_ref, bkv_ref, wo_ref, bo_ref,
               w1_ref, b1_ref, w2_ref, b2_ref,
               g1_ref, be1_ref, g2_ref, be2_ref, o_ref, kv_ref):
        qi = pl.program_id(1)

        # K/V projection over the full sequence: computed ONCE per batch element
        # (qi == 0) into a persistent VMEM scratch. The qi grid axis is innermost
        # and marked "arbitrary", so the scratch stays valid for later q-tiles.
        @pl.when(qi == 0)
        def _():
            x_full = x_ref[0]                                   # (S, D) bf16
            kv = (jnp.dot(x_full, wkv_ref[...],
                          preferred_element_type=jnp.float32)
                  + bkv_ref[...])                               # (S, 2D) f32
            kv_ref[0] = kv[:, :D].astype(jnp.bfloat16)          # K
            kv_ref[1] = kv[:, D:].astype(jnp.bfloat16)          # V

        # Residual / Q input for this q-tile: slice the Ref, not a loaded value.
        q_start = pl.multiple_of(qi * TQ, TQ)
        xq = x_ref[0, pl.ds(q_start, TQ), :]                    # (TQ, D) bf16
        xq_f32 = xq.astype(jnp.float32)                         # residual in f32

        # Q projection for this q-tile; 1/sqrt(DH) is pre-folded into wq/bq.
        q = (jnp.dot(xq, wq_ref[...], preferred_element_type=jnp.float32)
             + bq_ref[...])                                     # (TQ, D) f32
        q_bf = q.astype(jnp.bfloat16)
        k_bf = kv_ref[0]                                        # (S, D) bf16
        v_bf = kv_ref[1]                                        # (S, D) bf16

        # Per-head attention with out_proj folded into one f32 accumulator.
        # DH < 128 here, so folding beats lane-concatenating heads; only one
        # (TQ, S) score tile is live at a time.
        attn = jnp.zeros((TQ, D), jnp.float32) + bo_ref[...]
        for h in range(H):
            sl = slice(h * DH, (h + 1) * DH)
            s = lax.dot_general(q_bf[:, sl], k_bf[:, sl],
                                (((1,), (1,)), ((), ())),
                                preferred_element_type=jnp.float32)    # (TQ, S)
            m = jnp.max(s, axis=-1, keepdims=True)
            p = jnp.exp(s - m)                                         # unnormalized
            denom = jnp.sum(p, axis=-1, keepdims=True)
            ctx = jnp.dot(p.astype(jnp.bfloat16), v_bf[:, sl],
                          preferred_element_type=jnp.float32)          # (TQ, DH)
            # Normalize AFTER the PV matmul: TQ*DH multiplies instead of TQ*S.
            ctx = ctx * pl.reciprocal(denom, approx=True)
            attn = attn + jnp.dot(ctx.astype(jnp.bfloat16), wo_ref[h],
                                  preferred_element_type=jnp.float32)  # (TQ, D)

        # TODO(synk): dropout(p=0.1) after attention / FFN is identity at inference.
        y = _layernorm(xq_f32 + attn, g1_ref[...], be1_ref[...])       # post-norm 1

        h1 = jnp.maximum(
            jnp.dot(y.astype(jnp.bfloat16), w1_ref[...],
                    preferred_element_type=jnp.float32) + b1_ref[...], 0.0)
        ff = (jnp.dot(h1.astype(jnp.bfloat16), w2_ref[...],
                      preferred_element_type=jnp.float32) + b2_ref[...])

        # Post-norm 2; cast to bf16 only at the store (inter-layer activations bf16).
        o_ref[0] = _layernorm(y + ff, g2_ref[...], be2_ref[...]).astype(o_ref.dtype)

    return kernel


def pallas_encoder_layer(x, lp, num_heads, vmem_limit=None):
    """x: (B, S, D) bf16, lp: pre-transposed/bf16 layer params -> (B, S, D) bf16."""
    B, S, D = x.shape
    TQ = _pick_tile(S, (256, 128, 64, 32, 16, 8))
    kernel = make_encoder_layer_kernel(S, TQ, D, num_heads)

    weights = [lp["wq_t"], lp["bq"], lp["wkv_t"], lp["bkv"], lp["wo_t"], lp["bo"],
               lp["w1_t"], lp["b1"], lp["w2_t"], lp["b2"],
               lp["g1"], lp["be1"], lp["g2"], lp["be2"]]

    # Constant index maps (ndim bound per weight, no late-binding closure bug).
    # TODO(synk): mark these single-buffered (pipeline_mode=pl.Buffered(1)) once the
    # installed jax supports pipeline_mode on TPU BlockSpecs.
    w_specs = [pl.BlockSpec(w.shape, _const_index_map(w.ndim)) for w in weights]

    return pl.pallas_call(
        kernel,
        grid=(B, S // TQ),
        out_shape=jax.ShapeDtypeStruct((B, S, D), jnp.bfloat16),
        in_specs=[pl.BlockSpec((1, S, D), lambda b, qi: (b, 0, 0))] + w_specs,
        out_specs=pl.BlockSpec((1, TQ, D), lambda b, qi: (b, qi, 0)),
        scratch_shapes=[pltpu.VMEM((2, S, D), jnp.bfloat16)],   # K / V for current b
        compiler_params=pltpu.CompilerParams(
            dimension_semantics=("parallel", "arbitrary"),
            vmem_limit_bytes=vmem_limit),
    )(x, *weights)


# ---------------------------------------------------------------------------
# Parameters (PyTorch-style f32) + kernel-friendly prepared params
# ---------------------------------------------------------------------------

def init_params(key, input_dim, model_dim, num_heads, num_layers, output_dim):
    D, FF = model_dim, 4 * model_dim
    keys = jax.random.split(key, 4 + num_layers)

    def dense(k, out_f, in_f):
        kw, kb = jax.random.split(k)
        s = 1.0 / math.sqrt(in_f)
        return (jax.random.uniform(kw, (out_f, in_f), jnp.float32, -s, s),
                jax.random.uniform(kb, (out_f,), jnp.float32, -s, s))

    emb_w, emb_b = dense(keys[0], D, input_dim)
    out_w, out_b = dense(keys[1], output_dim, D)

    layers = []
    for li in range(num_layers):
        lk = jax.random.split(keys[2 + li], 4)
        in_proj_w, in_proj_b = dense(lk[0], 3 * D, D)
        out_proj_w, out_proj_b = dense(lk[1], D, D)
        l1_w, l1_b = dense(lk[2], FF, D)
        l2_w, l2_b = dense(lk[3], D, FF)
        layers.append(dict(
            in_proj_w=in_proj_w, in_proj_b=in_proj_b,
            out_proj_w=out_proj_w, out_proj_b=out_proj_b,
            linear1_w=l1_w, linear1_b=l1_b,
            linear2_w=l2_w, linear2_b=l2_b,
            norm1_g=jnp.ones((D,), jnp.float32), norm1_b=jnp.zeros((D,), jnp.float32),
            norm2_g=jnp.ones((D,), jnp.float32), norm2_b=jnp.zeros((D,), jnp.float32),
        ))
    return dict(emb_w=emb_w, emb_b=emb_b, out_w=out_w, out_b=out_b, layers=layers)


def prepare_fast_params(params, num_heads):
    """Pre-transpose weights to [in, out] bf16, split Q vs KV projections, fold the
    1/sqrt(head_dim) scale into Q, pre-split the out_proj per head, pad the output
    head to 128 lanes."""
    D = params["emb_w"].shape[0]
    DH = D // num_heads
    scale = 1.0 / math.sqrt(DH)
    out_dim = params["out_w"].shape[0]
    OP = ((out_dim + 127) // 128) * 128              # lane-dense padded output width

    def tw(w):                                       # [out,in] -> [in,out], bf16
        return jnp.asarray(w.T, jnp.bfloat16)

    def row(b):
        return jnp.asarray(b, jnp.float32).reshape(1, -1)

    out_wt = jnp.zeros((D, OP), jnp.bfloat16).at[:, :out_dim].set(tw(params["out_w"]))
    out_b = jnp.zeros((1, OP), jnp.float32).at[0, :out_dim].set(params["out_b"])

    fp = dict(
        emb_wt=tw(params["emb_w"]), emb_b=row(params["emb_b"]),
        out_wt=out_wt, out_b=out_b, out_dim=out_dim,
        vmem_limit=_default_vmem_limit_bytes(), layers=[],
    )
    for lp in params["layers"]:
        wqkv = lp["in_proj_w"].at[:D].multiply(scale)    # fold scale into Q rows
        bqkv = lp["in_proj_b"].at[:D].multiply(scale)
        fp["layers"].append(dict(
            wq_t=tw(wqkv[:D]), bq=row(bqkv[:D]),
            wkv_t=tw(wqkv[D:]), bkv=row(bqkv[D:]),
            # out_proj pre-split per head: (H, DH, D) so the kernel never slices lanes
            wo_t=tw(lp["out_proj_w"]).reshape(num_heads, DH, D),
            bo=row(lp["out_proj_b"]),
            w1_t=tw(lp["linear1_w"]), b1=row(lp["linear1_b"]),
            w2_t=tw(lp["linear2_w"]), b2=row(lp["linear2_b"]),
            g1=row(lp["norm1_g"]), be1=row(lp["norm1_b"]),
            g2=row(lp["norm2_g"]), be2=row(lp["norm2_b"]),
        ))
    return fp


# ---------------------------------------------------------------------------
# Forward pass built from Pallas kernels
# ---------------------------------------------------------------------------

def forward(fp, x, num_heads):
    """x: (B, S, input_dim) f32 -> (B, S, output_dim) f32."""
    B, S, Fin = x.shape
    D = fp["emb_wt"].shape[1]
    vmem_limit = fp["vmem_limit"]

    # Embedding linear; inter-layer activations kept in bf16 (halves HBM traffic).
    h = pallas_linear(x.reshape(B * S, Fin), fp["emb_wt"], fp["emb_b"],
                      out_dtype=jnp.bfloat16, vmem_limit=vmem_limit)
    h = h.reshape(B, S, D)

    # TODO(synk): for very small B*S*D, fuse the layer loop into a single kernel to
    # avoid per-layer pallas_call launch + HBM round trips of h.
    for lp in fp["layers"]:
        h = pallas_encoder_layer(h, lp, num_heads, vmem_limit=vmem_limit)

    out = pallas_linear(h.reshape(B * S, D), fp["out_wt"], fp["out_b"],
                        out_dtype=jnp.float32, vmem_limit=vmem_limit)
    return out[:, :fp["out_dim"]].reshape(B, S, fp["out_dim"])


# Pure-JAX f32 reference (same math as the PyTorch module) for a sanity check.
def forward_ref(params, x, num_heads):
    def lin(a, w, b):
        return a @ w.T + b

    h = lin(x, params["emb_w"], params["emb_b"])
    B, S, D = h.shape
    DH = D // num_heads
    for lp in params["layers"]:
        qkv = lin(h, lp["in_proj_w"], lp["in_proj_b"])
        q, k, v = qkv[..., :D], qkv[..., D:2 * D], qkv[..., 2 * D:]
        q = q.reshape(B, S, num_heads, DH).transpose(0, 2, 1, 3) / math.sqrt(DH)
        k = k.reshape(B, S, num_heads, DH).transpose(0, 2, 1, 3)
        v = v.reshape(B, S, num_heads, DH).transpose(0, 2, 1, 3)
        s = jnp.einsum("bhqd,bhkd->bhqk", q, k)
        p = jax.nn.softmax(s, axis=-1)
        a = jnp.einsum("bhqk,bhkd->bhqd", p, v).transpose(0, 2, 1, 3).reshape(B, S, D)
        a = lin(a, lp["out_proj_w"], lp["out_proj_b"])
        y = h + a
        mu = y.mean(-1, keepdims=True)
        var = ((y - mu) ** 2).mean(-1, keepdims=True)
        y = (y - mu) / jnp.sqrt(var + 1e-5) * lp["norm1_g"] + lp["norm1_b"]
        ff = lin(jax.nn.relu(lin(y, lp["linear1_w"], lp["linear1_b"])),
                 lp["linear2_w"], lp["linear2_b"])
        z = y + ff
        mu = z.mean(-1, keepdims=True)
        var = ((z - mu) ** 2).mean(-1, keepdims=True)
        h = (z - mu) / jnp.sqrt(var + 1e-5) * lp["norm2_g"] + lp["norm2_b"]
    return lin(h, params["out_w"], params["out_b"])


if __name__ == "__main__":
    # Small shapes consistent with the module's forward.
    B, S = 2, 8
    input_dim, model_dim, num_heads, num_layers, output_dim = 16, 32, 4, 2, 3

    key = jax.random.PRNGKey(0)
    kx, kp = jax.random.split(key)
    x = jax.random.normal(kx, (B, S, input_dim), jnp.float32)
    params = init_params(kp, input_dim, model_dim, num_heads, num_layers, output_dim)
    fp = prepare_fast_params(params, num_heads)

    out = forward(fp, x, num_heads)
    out = jax.block_until_ready(out)

    ref = forward_ref(params, x, num_heads)
    assert out.shape == (B, S, output_dim)
    # Kernel uses bf16 operands / bf16 inter-layer activations (f32 accumulation,
    # f32 LayerNorm stats) vs. an f32 reference, so tolerances are loosened.
    assert jnp.allclose(out, ref, atol=1e-1, rtol=1e-1), (
        "mismatch vs reference, max abs diff "
        f"{float(jnp.max(jnp.abs(out - ref)))}")

    print("KERNEL_OK")
</pallas_src>

<mosaic_0001>
module attributes {stable_mosaic.version = 11 : i64} {
  func.func @_linear_kernel(%arg0: i32, %arg1: memref<16x16xf32, #tpu.memory_space<vmem>>, %arg2: memref<16x32xbf16, #tpu.memory_space<vmem>>, %arg3: memref<1x32xf32, #tpu.memory_space<vmem>>, %arg4: memref<16x32xbf16, #tpu.memory_space<vmem>>) attributes {dimension_semantics = [#tpu.dimension_semantics<parallel>], iteration_bounds = array<i64: 1>, scalar_prefetch = 0 : i64, scratch_operands = 0 : i64, tpu.core_type = #tpu.core_type<tc>, window_params = [{transform_indices = @transform_0, window_bounds = array<i64: 16, 16>}, {pipeline_mode = #tpu.pipeline_mode<synchronous>, transform_indices = @transform_1, window_bounds = array<i64: 16, 32>}, {pipeline_mode = #tpu.pipeline_mode<synchronous>, transform_indices = @transform_2, window_bounds = array<i64: 1, 32>}, {transform_indices = @transform_3, window_bounds = array<i64: 16, 32>}]} {
    %c0 = arith.constant 0 : index
    %c0_0 = arith.constant 0 : index
    %0 = vector.load %arg1[%c0, %c0_0] : memref<16x16xf32, #tpu.memory_space<vmem>>, vector<16x16xf32>
    %1 = arith.truncf %0 : vector<16x16xf32> to vector<16x16xbf16>
    %c0_1 = arith.constant 0 : index
    %c0_2 = arith.constant 0 : index
    %2 = vector.load %arg2[%c0_1, %c0_2] : memref<16x32xbf16, #tpu.memory_space<vmem>>, vector<16x32xbf16>
    %cst = arith.constant dense<0.000000e+00> : vector<16x32xf32>
    %3 = tpu.matmul %1, %2, %cst {dimension_numbers = #tpu.dot_dimension_numbers<[1], [0], [0], [1], [0, 0, 1, 1], [], []>} : vector<16x16xbf16>, vector<16x32xbf16>, vector<16x32xf32> -> vector<16x32xf32>
    %c0_3 = arith.constant 0 : index
    %c0_4 = arith.constant 0 : index
    %4 = vector.load %arg3[%c0_3, %c0_4] : memref<1x32xf32, #tpu.memory_space<vmem>>, vector<1x32xf32>
    %5 = vector.broadcast %4 : vector<1x32xf32> to vector<16x32xf32>
    %6 = arith.addf %3, %5 : vector<16x32xf32>
    %7 = arith.truncf %6 : vector<16x32xf32> to vector<16x32xbf16>
    %c0_5 = arith.constant 0 : index
    %c0_6 = arith.constant 0 : index
    %8 = vector.load %arg4[%c0_5, %c0_6] : memref<16x32xbf16, #tpu.memory_space<vmem>>, vector<16x32xbf16>
    tpu.vector_store %arg4[%c0_5, %c0_6], %7 {strides = array<i32>} : memref<16x32xbf16, #tpu.memory_space<vmem>>, vector<16x32xbf16>,
    return
  }
  func.func @transform_0(%arg0: i32) -> (i32, i32) {
    %c0_i32 = arith.constant 0 : i32
    %c0_i32_0 = arith.constant 0 : i32
    return %arg0, %c0_i32 : i32, i32
  }
  func.func @transform_1(%arg0: i32) -> (i32, i32) {
    %c0_i32 = arith.constant 0 : i32
    %c0_i32_0 = arith.constant 0 : i32
    %c0_i32_1 = arith.constant 0 : i32
    return %c0_i32, %c0_i32_0 : i32, i32
  }
  func.func @transform_2(%arg0: i32) -> (i32, i32) {
    %c0_i32 = arith.constant 0 : i32
    %c0_i32_0 = arith.constant 0 : i32
    %c0_i32_1 = arith.constant 0 : i32
    return %c0_i32, %c0_i32_0 : i32, i32
  }
  func.func @transform_3(%arg0: i32) -> (i32, i32) {
    %c0_i32 = arith.constant 0 : i32
    %c0_i32_0 = arith.constant 0 : i32
    return %arg0, %c0_i32 : i32, i32
  }
}

</mosaic_0001>

<bundles_post_ra>
// kernel: tpu_custom_call.1
= control target key start
LH: loop header
LB: loop body
LE: loop exit
PB: predicated region body
PF: predicated region fallthrough
CT: control target
= control target key end

     0   :  { %8 = vsyncpa [#allocation3], 0  ;;  %s307_s0 = inlined_call_operand.hbm [shape: f32[16,16], index: 0, kind: input, shape index: {}]   ;;  %s308_s1 = inlined_call_operand.hbm [shape: bf16[16,32], index: 1, kind: input, shape index: {}]   ;;  %s309_s2 = inlined_call_operand.vmem [shape: f32[1,32], index: 2, kind: input, shape index: {}]   ;;  %s310_s3 = inlined_call_operand.hbm [shape: bf16[16,32], index: 3, kind: output, shape index: {}]  }
   0x1   :  { %9 = vsyncpa [#allocation6], 0 }
   0x2   :  { %10 = vsyncpa [#allocation4], 0  ;;  %s233_s12 = smov [#allocation2]   ;;  %s161_s16 = scalar_lea.hbm %s307_s0, 256 }
   0x3   :  { %s16_s13 = sshll.u32 %s233_s12, 4  ;;  %p162_p0 = scmp.ne.s32.totalorder %s307_s0, %s161_s16  ;;  %s17_s13 = int_to_ptr.vmem [resolvable:$true] %s16_s13 }
   0x4   :  { %p165_p1 = scmp.lt.u32.totalorder %s161_s16, %s307_s0 }
   0x6   :  { %p167_p2 = pnand %p165_p1, %p162_p0 }
   0x8   :  { %170 = shalt.err (!%p167_p2)
}
   0x9   :  { %s171_s21 = scalar_lea.vmem %s17_s13, 256  ;;  %p176_p4 = scmp.lt.s32.totalorder %s17_s13, %s17_s13 }
   0xa   :  { %p172_p3 = scmp.ne.s32.totalorder %s17_s13, %s171_s21  ;;  %p177_p5 = scmp.lt.s32.totalorder %s171_s21, %s171_s21 }
   0xc   :  { %p178_p6 = por %p177_p5, %p176_p4 }
   0xe   :  { %p179_p7 = pnand %p178_p6, %p172_p3 }
  0x10   :  { %182 = shalt.err (!%p179_p7)
}
  0x11   :  { %s234_s22 = smov 128   ;;  %s235_s23 = smov 8  }
  0x12   :  { %22 = dma.hbm_to_vmem [thread:$0]  %s307_s0, 256, %s17_s13, [#allocation3], %s234_s22, %s234_s22, %s235_s23  }
  0x13   :  { %s236_s26 = smov [#allocation5]   ;;  %s183_s30 = scalar_lea.hbm %s308_s1, 128 }
  0x14   :  { %s28_s27 = sshll.u32 %s236_s26, 4  ;;  %p184_p8 = scmp.ne.s32.totalorder %s308_s1, %s183_s30  ;;  %s29_s27 = int_to_ptr.vmem [resolvable:$true] %s28_s27 }
  0x15   :  { %p187_p9 = scmp.lt.u32.totalorder %s183_s30, %s308_s1 }
  0x17   :  { %p189_p10 = pnand %p187_p9, %p184_p8 }
  0x19   :  { %192 = shalt.err (!%p189_p10)
}
  0x1a   :  { %s193_s8 = scalar_lea.vmem %s29_s27, 128  ;;  %p198_p12 = scmp.lt.s32.totalorder %s29_s27, %s29_s27 }
  0x1b   :  { %p194_p11 = scmp.ne.s32.totalorder %s29_s27, %s193_s8  ;;  %p199_p13 = scmp.lt.s32.totalorder %s193_s8, %s193_s8 }
  0x1d   :  { %p200_p0 = por %p199_p13, %p198_p12 }
  0x1f   :  { %p201_p1 = pnand %p200_p0, %p194_p11 }
  0x21   :  { %204 = shalt.err (!%p201_p1)
}
  0x22   :  { %s237_s0 = smov 64   ;;  %s238_s9 = smov 4  }
  0x23   :  { %34 = dma.hbm_to_vmem [thread:$0]  %s308_s1, 128, %s29_s27, [#allocation6], %s237_s0, %s237_s0, %s238_s9  }
  0x24   :  { %227 = dma.done.wait [#allocation3], 256  }
  0x25   :  { %228 = vsyncadd [#allocation3], 4294967040 }
  0x26   :  { %229 = dma.done.wait [#allocation6], 128  }
  0x27   :  { %230 = vsyncadd [#allocation6], 4294967168  ;;  %v239_v0 = vmov 0.0   ;;  %vm240_vm0 = vmmov 0   ;;  %v160_v1 = vld [vmem:[#allocation5] sm:$0xff]   ;;  %v44_v2 = vld [vmem:[#allocation2] sm:$0xff] }
  0x28   :  { %145 = vmatprep.subr.bf16.mxu0 %v239_v0  ;;  %147 = vmatprep.mubr.msk.bf16.mxu0 %vm240_vm0, %v239_v0  ;;  %v45_v3 = vld [vmem:[#allocation2 + $0x8] sm:$0xff]  ;;  %vm62_vm1 = vcmask 130048   ;;  %v136_v5 = vld [vmem:[%s309_s2] ss:$0 sm:$0xff]  ;;  %vm115_vm2 = vcmask 257024   ;;  %s241_s1 = smov [#allocation7]  }
  0x29   :  { %146 = vmatpush3.bf16.msra.mxu0 %v160_v1  ;;  %v46_v4 = vpack.c.bf16 %v45_v3, %v44_v2  ;;  %s123_s14 = sshll.u32 %s241_s1, 4  ;;  %s124_s14 = int_to_ptr.vmem [resolvable:$true] %s123_s14 }
  0x2a   :  { %s205_s15 = scalar_lea.vmem %s124_s14, 128  ;;  %p210_p3 = scmp.lt.s32.totalorder %s124_s14, %s124_s14 }
  0x2b   :  { %p206_p2 = scmp.ne.s32.totalorder %s124_s14, %s205_s15  ;;  %p211_p4 = scmp.lt.s32.totalorder %s205_s15, %s205_s15 }
  0x2c   :  { %148 = vmatmul.mubr.msk.bf16.vlgmr.msra.gmra.mrb[0].mxu0 %vm62_vm1, %v46_v4 }
  0x2d   :  { %p212_p5 = por %p211_p4, %p210_p3 }
  0x2f   :  { %p213_p6 = pnand %p212_p5, %p206_p2 }
  0xff   :  { %v100_v6 = vpop.f32.mrb[0].mxu0 }
 0x100   :  { %v101_v7 = vadd.f32 %v136_v5, %v100_v6  ;;  %v149_v8 = vpop.f32.mrb[1].mxu0 }
 0x101   :  { %v103_v9 = vpop.f32.mrb[2].mxu0 }
 0x102   :  { %v141_v10 = vpack.c.bf16 %v101_v7, %v101_v7  ;;  %v104_v11 = vadd.f32 %v136_v5, %v103_v9  ;;  %v150_v12 = vpop.f32.mrb[3].mxu0 }
 0x104   :  { %v142_v13 = vpack.c.bf16 %v104_v11, %v104_v11  ;;  %116 = vst.msk [vmem:[#allocation7] sm:$0xf] %vm115_vm2, %v141_v10 }
 0x106   :  { %117 = vst.msk [vmem:[#allocation7 + $0x4] sm:$0xf] %vm115_vm2, %v142_v13 }
 0x107   :  { %216 = shalt.err (!%p213_p6)
}
 0x108   :  { %s217_s17 = scalar_lea.hbm %s310_s3, 128 }
 0x109   :  { %p218_p7 = scmp.ne.s32.totalorder %s310_s3, %s217_s17  ;;  %p221_p8 = scmp.lt.u32.totalorder %s217_s17, %s310_s3 }
 0x10b   :  { %p223_p9 = pnand %p221_p8, %p218_p7 }
 0x10d   :  { %226 = shalt.err (!%p223_p9)
}
 0x10e   :  { %129 = dma.vmem_to_hbm [thread:$0]  %s124_s14, 128, %s310_s3, [#allocation4], %s237_s0, %s237_s0, %s238_s9  }
 0x10f   :  { %231 = dma.done.wait [#allocation4], 128  }
 0x110   :  { %232 = vsyncadd [#allocation4], 4294967168 }
 0x111   :  { %133 = vsyncpa [#allocation3], 1 }
 0x112   :  { %134 = vsyncpa [#allocation6], 1 }
 0x113   :  { %135 = vsyncpa [#allocation4], 1 }

</bundles_post_ra>
